<compile_context>
chip_gen: v7x
topology: tpu7x:2x2x1
jax: 0.10.0
libtpu: 0.0.40
codegen_flags: <defaults>
</compile_context>

<pallas_src>
import math
import jax
import jax.numpy as jnp
from jax.experimental import pallas as pl
from jax.experimental.pallas import tpu as pltpu

# Synthetic config (the original repo's `config['ANN']` dict).
CONFIG = {
    "ANN": {
        "input_size": 32,
        "hidden_layers": [64, 64],
        "num_classes": 10,
    }
}

LANE = 128          # vreg lane width
SUBLANE_BF16 = 16   # bf16 sublane packing (2 rows per 32-bit sublane)
MAX_TILE_B = 8192   # batch tile: large enough to amortize ~0.35us/grid-step
MIN_STEPS = 4       # target grid steps (keeps both v7x TCs busy)


def _round_up(n, m):
    return ((n + m - 1) // m) * m


def _cdiv(a, b):
    return (a + b - 1) // b


def make_mlp_kernel(num_linear_layers):
    """Fused MLP kernel. Args: (x_ref, w0_ref, b0_ref, ..., out_ref).

    Weights/activations are bf16 (MXU-native), biases + accumulator are f32.
    Intermediate accumulates are 128-lane padded (lane-dense VPU work); only
    the final store narrows to num_classes lanes.
    """

    def kernel(*refs):
        x_ref = refs[0]
        out_ref = refs[-1]
        param_refs = refs[1:-1]
        num_classes = out_ref.shape[-1]

        h = x_ref[...]                       # bf16 activations [tile_b, in]
        for i in range(num_linear_layers):
            w = param_refs[2 * i][...]       # bf16 [in_p, out_p]
            b = param_refs[2 * i + 1][...]   # f32  [1, out_p]
            acc = jnp.dot(h, w, preferred_element_type=jnp.float32) + b
            if i < num_linear_layers - 1:    # ReLU on every hidden layer
                h = jnp.maximum(acc, 0.0).astype(jnp.bfloat16)
            else:
                # Narrow HBM store: only the real num_classes lanes leave VMEM.
                out_ref[...] = acc[:, :num_classes].astype(out_ref.dtype)

    return kernel


def init_params(key, input_size, hidden_layers, num_classes):
    """Deterministic init mimicking nn.Linear default U(-1/sqrt(in), 1/sqrt(in)).

    Weights stored as [in, out] (transpose of PyTorch's [out, in]) so the
    kernel computes y = x @ W + b directly.
    """
    sizes = [input_size] + list(hidden_layers) + [num_classes]
    params = []
    for i in range(len(sizes) - 1):
        fan_in, fan_out = sizes[i], sizes[i + 1]
        key, kw, kb = jax.random.split(key, 3)
        bound = 1.0 / math.sqrt(fan_in)
        w = jax.random.uniform(kw, (fan_in, fan_out), jnp.float32, -bound, bound)
        b = jax.random.uniform(kb, (1, fan_out), jnp.float32, -bound, bound)
        params.append((w, b))
    return params


def prepare_params(params):
    """Zero-pad each layer's lane (output) dim to a multiple of 128, pad the
    matching input dim of the following layer, and cast weights to bf16.

    Padding is exact: padded lanes carry zero bias -> ReLU(0)=0 -> they only
    ever multiply zero-padded weight rows of the next layer.
    """
    prepared = []
    for layer_idx, (w, b) in enumerate(params):
        fan_in, fan_out = w.shape
        in_p = fan_in if layer_idx == 0 else _round_up(fan_in, LANE)
        out_p = _round_up(fan_out, LANE)
        w_p = jnp.zeros((in_p, out_p), jnp.float32).at[:fan_in, :fan_out].set(w)
        b_p = jnp.zeros((1, out_p), jnp.float32).at[:, :fan_out].set(b)
        prepared.append((w_p.astype(jnp.bfloat16), b_p))
    return prepared


def _pick_tile_b(batch):
    """Choose a sublane-aligned (16 for bf16) batch tile.

    Prefers >= MIN_STEPS grid steps when the batch allows it (v7x megacore),
    capped at MAX_TILE_B so large batches still get big, DMA-efficient tiles.
    """
    b16 = _round_up(batch, SUBLANE_BF16)
    if b16 >= MIN_STEPS * SUBLANE_BF16:
        tile_b = _round_up(_cdiv(b16, MIN_STEPS), SUBLANE_BF16)
    else:
        tile_b = b16
    return min(tile_b, MAX_TILE_B)


def ann_forward(x, prepared_params, num_classes):
    """Run the full MLP as a single Pallas TPU kernel, tiled over batch."""
    batch, in_features = x.shape
    num_linear = len(prepared_params)

    tile_b = _pick_tile_b(batch)
    padded_batch = _round_up(batch, tile_b)

    x_p = x.astype(jnp.bfloat16)
    if padded_batch != batch:
        x_p = jnp.pad(x_p, ((0, padded_batch - batch), (0, 0)))

    flat_params = []
    for w, b in prepared_params:
        flat_params.extend([w, b])

    in_specs = [pl.BlockSpec((tile_b, in_features), lambda i: (i, 0))]
    # Weights/biases: full-array blocks, constant index_map -> VMEM-resident
    # across all grid iterations (fetched once).
    for p in flat_params:
        in_specs.append(pl.BlockSpec(p.shape, lambda i: (0, 0)))

    # Narrow HBM output: last dim equals the full array dim (num_classes), so
    # the non-multiple-of-128 block shape is legal; the store is masked in
    # VMEM but the HBM stream carries only the real data.
    out_spec = pl.BlockSpec((tile_b, num_classes), lambda i: (i, 0))

    out_full = pl.pallas_call(
        make_mlp_kernel(num_linear),
        out_shape=jax.ShapeDtypeStruct((padded_batch, num_classes), jnp.float32),
        grid_spec=pltpu.PrefetchScalarGridSpec(
            num_scalar_prefetch=0,
            grid=(padded_batch // tile_b,),
            in_specs=in_specs,
            out_specs=out_spec,
        ),
        compiler_params=pltpu.CompilerParams(
            dimension_semantics=("parallel",),       # megacore on v7x
            vmem_limit_bytes=32 * 1024 * 1024,       # safe on v5e/v6e/v7x
        ),
    )(x_p, *flat_params)

    if padded_batch != batch:
        out_full = out_full[:batch]
    return out_full


def ann_reference_bf16(x, prepared_params, num_classes):
    """Plain-JAX reference mimicking the kernel's bf16 data path exactly."""
    h = x.astype(jnp.bfloat16)
    for i, (w, b) in enumerate(prepared_params):
        acc = jnp.dot(h, w, preferred_element_type=jnp.float32) + b
        if i < len(prepared_params) - 1:
            h = jnp.maximum(acc, 0.0).astype(jnp.bfloat16)
        else:
            acc_out = acc
    return acc_out[:, :num_classes]


def ann_reference_f32(x, params):
    """Pure f32 reference matching torch semantics (Linear + ReLU ... + Linear)."""
    h = x
    for i, (w, b) in enumerate(params):
        h = h @ w + b
        if i < len(params) - 1:
            h = jnp.maximum(h, 0.0)
    return h


if __name__ == "__main__":
    cfg = CONFIG["ANN"]
    batch = 8

    key = jax.random.PRNGKey(0)
    key, kx = jax.random.split(key)
    x = jax.random.normal(kx, (batch, cfg["input_size"]), jnp.float32)

    params = init_params(key, cfg["input_size"], cfg["hidden_layers"],
                         cfg["num_classes"])
    prepared = prepare_params(params)

    out = ann_forward(x, prepared, cfg["num_classes"])
    out = jax.block_until_ready(out)
    assert out.shape == (batch, cfg["num_classes"])

    # Tight check vs. a reference following the identical bf16/f32-acc path.
    ref_bf16 = ann_reference_bf16(x, prepared, cfg["num_classes"])
    assert jnp.allclose(out, ref_bf16, atol=1e-2, rtol=1e-2), \
        "mismatch vs bf16-parity reference"

    # Loose check vs. the original full-f32 torch-semantics reference
    # (bf16 weight/activation rounding is the only difference).
    ref_f32 = ann_reference_f32(x, params)
    assert jnp.allclose(out, ref_f32, atol=1e-1, rtol=1e-1), \
        "mismatch vs f32 reference"

    print("KERNEL_OK")
</pallas_src>

<mosaic_0001>
module attributes {stable_mosaic.version = 11 : i64} {
  func.func @kernel(%arg0: i32, %arg1: memref<16x32xbf16, #tpu.memory_space<vmem>>, %arg2: memref<32x128xbf16, #tpu.memory_space<vmem>>, %arg3: memref<1x128xf32, #tpu.memory_space<vmem>>, %arg4: memref<128x128xbf16, #tpu.memory_space<vmem>>, %arg5: memref<1x128xf32, #tpu.memory_space<vmem>>, %arg6: memref<128x128xbf16, #tpu.memory_space<vmem>>, %arg7: memref<1x128xf32, #tpu.memory_space<vmem>>, %arg8: memref<16x10xf32, #tpu.memory_space<vmem>>) attributes {dimension_semantics = [#tpu.dimension_semantics<parallel>], iteration_bounds = array<i64: 1>, scalar_prefetch = 0 : i64, scratch_operands = 0 : i64, tpu.core_type = #tpu.core_type<tc>, window_params = [{transform_indices = @transform_0, window_bounds = array<i64: 16, 32>}, {pipeline_mode = #tpu.pipeline_mode<synchronous>, transform_indices = @transform_1, window_bounds = array<i64: 32, 128>}, {pipeline_mode = #tpu.pipeline_mode<synchronous>, transform_indices = @transform_2, window_bounds = array<i64: 1, 128>}, {pipeline_mode = #tpu.pipeline_mode<synchronous>, transform_indices = @transform_3, window_bounds = array<i64: 128, 128>}, {pipeline_mode = #tpu.pipeline_mode<synchronous>, transform_indices = @transform_4, window_bounds = array<i64: 1, 128>}, {pipeline_mode = #tpu.pipeline_mode<synchronous>, transform_indices = @transform_5, window_bounds = array<i64: 128, 128>}, {pipeline_mode = #tpu.pipeline_mode<synchronous>, transform_indices = @transform_6, window_bounds = array<i64: 1, 128>}, {transform_indices = @transform_7, window_bounds = array<i64: 16, 10>}]} {
    %c0 = arith.constant 0 : index
    %c0_0 = arith.constant 0 : index
    %0 = vector.load %arg1[%c0, %c0_0] : memref<16x32xbf16, #tpu.memory_space<vmem>>, vector<16x32xbf16>
    %c0_1 = arith.constant 0 : index
    %c0_2 = arith.constant 0 : index
    %1 = vector.load %arg2[%c0_1, %c0_2] : memref<32x128xbf16, #tpu.memory_space<vmem>>, vector<32x128xbf16>
    %c0_3 = arith.constant 0 : index
    %c0_4 = arith.constant 0 : index
    %2 = vector.load %arg3[%c0_3, %c0_4] : memref<1x128xf32, #tpu.memory_space<vmem>>, vector<1x128xf32>
    %cst = arith.constant dense<0.000000e+00> : vector<16x128xf32>
    %3 = tpu.matmul %0, %1, %cst {dimension_numbers = #tpu.dot_dimension_numbers<[1], [0], [0], [1], [0, 0, 1, 1], [], []>} : vector<16x32xbf16>, vector<32x128xbf16>, vector<16x128xf32> -> vector<16x128xf32>
    %4 = vector.broadcast %2 : vector<1x128xf32> to vector<16x128xf32>
    %5 = arith.addf %3, %4 : vector<16x128xf32>
    %cst_5 = arith.constant 0.000000e+00 : f32
    %6 = vector.broadcast %cst_5 : f32 to vector<16x128xf32>
    %7 = arith.maximumf %5, %6 : vector<16x128xf32>
    %8 = arith.truncf %7 : vector<16x128xf32> to vector<16x128xbf16>
    %c0_6 = arith.constant 0 : index
    %c0_7 = arith.constant 0 : index
    %9 = vector.load %arg4[%c0_6, %c0_7] : memref<128x128xbf16, #tpu.memory_space<vmem>>, vector<128x128xbf16>
    %c0_8 = arith.constant 0 : index
    %c0_9 = arith.constant 0 : index
    %10 = vector.load %arg5[%c0_8, %c0_9] : memref<1x128xf32, #tpu.memory_space<vmem>>, vector<1x128xf32>
    %cst_10 = arith.constant dense<0.000000e+00> : vector<16x128xf32>
    %11 = tpu.matmul %8, %9, %cst_10 {dimension_numbers = #tpu.dot_dimension_numbers<[1], [0], [0], [1], [0, 0, 1, 1], [], []>} : vector<16x128xbf16>, vector<128x128xbf16>, vector<16x128xf32> -> vector<16x128xf32>
    %12 = vector.broadcast %10 : vector<1x128xf32> to vector<16x128xf32>
    %13 = arith.addf %11, %12 : vector<16x128xf32>
    %cst_11 = arith.constant 0.000000e+00 : f32
    %14 = vector.broadcast %cst_11 : f32 to vector<16x128xf32>
    %15 = arith.maximumf %13, %14 : vector<16x128xf32>
    %16 = arith.truncf %15 : vector<16x128xf32> to vector<16x128xbf16>
    %c0_12 = arith.constant 0 : index
    %c0_13 = arith.constant 0 : index
    %17 = vector.load %arg6[%c0_12, %c0_13] : memref<128x128xbf16, #tpu.memory_space<vmem>>, vector<128x128xbf16>
    %c0_14 = arith.constant 0 : index
    %c0_15 = arith.constant 0 : index
    %18 = vector.load %arg7[%c0_14, %c0_15] : memref<1x128xf32, #tpu.memory_space<vmem>>, vector<1x128xf32>
    %cst_16 = arith.constant dense<0.000000e+00> : vector<16x128xf32>
    %19 = tpu.matmul %16, %17, %cst_16 {dimension_numbers = #tpu.dot_dimension_numbers<[1], [0], [0], [1], [0, 0, 1, 1], [], []>} : vector<16x128xbf16>, vector<128x128xbf16>, vector<16x128xf32> -> vector<16x128xf32>
    %20 = vector.broadcast %18 : vector<1x128xf32> to vector<16x128xf32>
    %21 = arith.addf %19, %20 : vector<16x128xf32>
    %22 = vector.extract_strided_slice %21 {offsets = [0, 0], sizes = [16, 10], strides = [1, 1]} : vector<16x128xf32> to vector<16x10xf32>
    %c0_17 = arith.constant 0 : index
    %c0_18 = arith.constant 0 : index
    %23 = vector.load %arg8[%c0_17, %c0_18] : memref<16x10xf32, #tpu.memory_space<vmem>>, vector<16x10xf32>
    tpu.vector_store %arg8[%c0_17, %c0_18], %22 {strides = array<i32>} : memref<16x10xf32, #tpu.memory_space<vmem>>, vector<16x10xf32>,
    return
  }
  func.func @transform_0(%arg0: i32) -> (i32, i32) {
    %c0_i32 = arith.constant 0 : i32
    %c0_i32_0 = arith.constant 0 : i32
    return %arg0, %c0_i32 : i32, i32
  }
  func.func @transform_1(%arg0: i32) -> (i32, i32) {
    %c0_i32 = arith.constant 0 : i32
    %c0_i32_0 = arith.constant 0 : i32
    %c0_i32_1 = arith.constant 0 : i32
    return %c0_i32, %c0_i32_0 : i32, i32
  }
  func.func @transform_2(%arg0: i32) -> (i32, i32) {
    %c0_i32 = arith.constant 0 : i32
    %c0_i32_0 = arith.constant 0 : i32
    %c0_i32_1 = arith.constant 0 : i32
    return %c0_i32, %c0_i32_0 : i32, i32
  }
  func.func @transform_3(%arg0: i32) -> (i32, i32) {
    %c0_i32 = arith.constant 0 : i32
    %c0_i32_0 = arith.constant 0 : i32
    %c0_i32_1 = arith.constant 0 : i32
    return %c0_i32, %c0_i32_0 : i32, i32
  }
  func.func @transform_4(%arg0: i32) -> (i32, i32) {
    %c0_i32 = arith.constant 0 : i32
    %c0_i32_0 = arith.constant 0 : i32
    %c0_i32_1 = arith.constant 0 : i32
    return %c0_i32, %c0_i32_0 : i32, i32
  }
  func.func @transform_5(%arg0: i32) -> (i32, i32) {
    %c0_i32 = arith.constant 0 : i32
    %c0_i32_0 = arith.constant 0 : i32
    %c0_i32_1 = arith.constant 0 : i32
    return %c0_i32, %c0_i32_0 : i32, i32
  }
  func.func @transform_6(%arg0: i32) -> (i32, i32) {
    %c0_i32 = arith.constant 0 : i32
    %c0_i32_0 = arith.constant 0 : i32
    %c0_i32_1 = arith.constant 0 : i32
    return %c0_i32, %c0_i32_0 : i32, i32
  }
  func.func @transform_7(%arg0: i32) -> (i32, i32) {
    %c0_i32 = arith.constant 0 : i32
    %c0_i32_0 = arith.constant 0 : i32
    return %arg0, %c0_i32 : i32, i32
  }
}

</mosaic_0001>

<bundles_post_ra>
// kernel: tpu_custom_call.1
= control target key start
LH: loop header
LB: loop body
LE: loop exit
PB: predicated region body
PF: predicated region fallthrough
CT: control target
= control target key end

     0   :  { %12 = vsyncpa [#allocation3], 0  ;;  %s820_s0 = inlined_call_operand.hbm [shape: bf16[16,32], index: 0, kind: input, shape index: {}]   ;;  %s821_s1 = inlined_call_operand.hbm [shape: bf16[32,128], index: 1, kind: input, shape index: {}]   ;;  %s822_s2 = inlined_call_operand.vmem [shape: f32[1,128], index: 2, kind: input, shape index: {}]   ;;  %s823_s3 = inlined_call_operand.hbm [shape: bf16[128,128], index: 3, kind: input, shape index: {}]   ;;  %s824_s4 = inlined_call_operand.vmem [shape: f32[1,128], index: 4, kind: input, shape index: {}]   ;;  %s825_s5 = inlined_call_operand.hbm [shape: bf16[128,128], index: 5, kind: input, shape index: {}]   ;;  %s826_s6 = inlined_call_operand.vmem [shape: f32[1,128], index: 6, kind: input, shape index: {}]   ;;  %s827_s7 = inlined_call_operand.hbm [shape: f32[16,10], index: 7, kind: output, shape index: {}]  }
   0x1   :  { %13 = vsyncpa [#allocation6], 0 }
   0x2   :  { %14 = vsyncpa [#allocation9], 0 }
   0x3   :  { %15 = vsyncpa [#allocation4], 0  ;;  %s650_s24 = smov [#allocation5]   ;;  %s651_s26 = smov [#allocation2]  }
   0x4   :  { %s33_s25 = sshll.u32 %s650_s24, 4  ;;  %s21_s27 = sshll.u32 %s651_s26, 4  ;;  %s34_s25 = int_to_ptr.vmem [resolvable:$true] %s33_s25  ;;  %s701_s27 = int_to_ptr.vmem [resolvable:$true] %s21_s27 }
   0x5   :  { %s532_s30 = scalar_lea.hbm %s821_s1, 256 }
   0x6   :  { %p533_p0 = scmp.ne.s32.totalorder %s821_s1, %s532_s30  ;;  %p536_p1 = scmp.lt.u32.totalorder %s532_s30, %s821_s1 }
   0x8   :  { %p538_p2 = pnand %p536_p1, %p533_p0 }
   0xa   :  { %541 = shalt.err (!%p538_p2)
}
   0xb   :  { %s542_s12 = scalar_lea.vmem %s34_s25, 256  ;;  %p547_p4 = scmp.lt.s32.totalorder %s34_s25, %s34_s25 }
   0xc   :  { %p543_p3 = scmp.ne.s32.totalorder %s34_s25, %s542_s12  ;;  %p548_p5 = scmp.lt.s32.totalorder %s542_s12, %s542_s12 }
   0xe   :  { %p549_p6 = por %p548_p5, %p547_p4 }
  0x10   :  { %p550_p7 = pnand %p549_p6, %p543_p3 }
  0x12   :  { %553 = shalt.err (!%p550_p7)
}
  0x13   :  { %s652_s13 = smov 64   ;;  %s653_s14 = smov 4  }
  0x14   :  { %39 = dma.hbm_to_vmem [thread:$0]  %s821_s1, 256, %s34_s25, [#allocation6], %s652_s13, %s652_s13, %s653_s14  }
  0x15   :  { %s554_s19 = scalar_lea.hbm %s820_s0, 128 }
  0x16   :  { %p555_p8 = scmp.ne.s32.totalorder %s820_s0, %s554_s19  ;;  %p558_p9 = scmp.lt.u32.totalorder %s554_s19, %s820_s0 }
  0x18   :  { %p560_p10 = pnand %p558_p9, %p555_p8 }
  0x1a   :  { %563 = shalt.err (!%p560_p10)
}
  0x1b   :  { %s564_s24 = scalar_lea.vmem %s701_s27, 128  ;;  %p569_p12 = scmp.lt.s32.totalorder %s701_s27, %s701_s27 }
  0x1c   :  { %p565_p11 = scmp.ne.s32.totalorder %s701_s27, %s564_s24  ;;  %p570_p13 = scmp.lt.s32.totalorder %s564_s24, %s564_s24 }
  0x1e   :  { %p571_p0 = por %p570_p13, %p569_p12 }
  0x20   :  { %p572_p1 = pnand %p571_p0, %p565_p11 }
  0x22   :  { %575 = shalt.err (!%p572_p1)
}
  0x23   :  { %27 = dma.hbm_to_vmem [thread:$0]  %s820_s0, 128, %s701_s27, [#allocation3], %s652_s13, %s652_s13, %s653_s14  }
  0x24   :  { %s654_s26 = smov [#allocation7]   ;;  %s655_s29 = smov [#allocation8]  }
  0x25   :  { %s47_s28 = sshll.u32 %s654_s26, 4  ;;  %s61_s30 = sshll.u32 %s655_s29, 4  ;;  %s48_s28 = int_to_ptr.vmem [resolvable:$true] %s47_s28  ;;  %s738_s30 = int_to_ptr.vmem [resolvable:$true] %s61_s30 }
  0x26   :  { %s576_s10 = scalar_lea.hbm %s823_s3, 1024 }
  0x27   :  { %p577_p2 = scmp.ne.s32.totalorder %s823_s3, %s576_s10  ;;  %p580_p3 = scmp.lt.u32.totalorder %s576_s10, %s823_s3 }
  0x29   :  { %p582_p4 = pnand %p580_p3, %p577_p2 }
  0x2b   :  { %585 = shalt.err (!%p582_p4)
}
  0x2c   :  { %s586_s0 = scalar_lea.vmem %s48_s28, 1024  ;;  %p591_p6 = scmp.lt.s32.totalorder %s48_s28, %s48_s28 }
  0x2d   :  { %p587_p5 = scmp.ne.s32.totalorder %s48_s28, %s586_s0  ;;  %p592_p7 = scmp.lt.s32.totalorder %s586_s0, %s586_s0 }
  0x2f   :  { %p593_p8 = por %p592_p7, %p591_p6 }
  0x31   :  { %p594_p9 = pnand %p593_p8, %p587_p5 }
  0x33   :  { %597 = shalt.err (!%p594_p9)
}
  0x34   :  { %53 = dma.hbm_to_vmem [thread:$0]  %s823_s3, 1024, %s48_s28, [#allocation6], %s652_s13, %s652_s13, %s653_s14  }
  0x35   :  { %s598_s20 = scalar_lea.hbm %s825_s5, 1024 }
  0x36   :  { %p599_p10 = scmp.ne.s32.totalorder %s825_s5, %s598_s20  ;;  %p602_p11 = scmp.lt.u32.totalorder %s598_s20, %s825_s5 }
  0x38   :  { %p604_p12 = pnand %p602_p11, %p599_p10 }
  0x3a   :  { %607 = shalt.err (!%p604_p12)
}
  0x3b   :  { %s608_s1 = scalar_lea.vmem %s738_s30, 1024  ;;  %p613_p0 = scmp.lt.s32.totalorder %s738_s30, %s738_s30 }
  0x3c   :  { %p609_p13 = scmp.ne.s32.totalorder %s738_s30, %s608_s1  ;;  %p614_p1 = scmp.lt.s32.totalorder %s608_s1, %s608_s1 }
  0x3e   :  { %p615_p2 = por %p614_p1, %p613_p0 }
  0x40   :  { %p616_p3 = pnand %p615_p2, %p609_p13 }
  0x42   :  { %619 = shalt.err (!%p616_p3)
}
  0x43   :  { %67 = dma.hbm_to_vmem [thread:$0]  %s825_s5, 1024, %s738_s30, [#allocation9], %s652_s13, %s652_s13, %s653_s14  }
  0x44   :  { %642 = dma.done.wait [#allocation3], 128  }
  0x45   :  { %643 = vsyncadd [#allocation3], 4294967168 }
  0x46   :  { %644 = dma.done.wait [#allocation6], 1280  }
  0x47   :  { %645 = vsyncadd [#allocation6], 4294966016 }
  0x48   :  { %646 = dma.done.wait [#allocation9], 1024  }
  0x49   :  { %647 = vsyncadd [#allocation9], 4294966272  ;;  %v656_v0 = vmov 0.0   ;;  %vm657_vm0 = vmmov 0   ;;  %v513_v1 = vld [vmem:[#allocation5] sm:$0xff]   ;;  %v514_v2 = vld [vmem:[#allocation5 + $0x8] sm:$0xff]  }
  0x4a   :  { %454 = vmatprep.subr.bf16.mxu0 %v656_v0  ;;  %458 = vmatprep.mubr.msk.bf16.mxu0 %vm657_vm0, %v656_v0  ;;  %v516_v3 = vld [vmem:[#allocation7] sm:$0xff]   ;;  %v515_v4 = vld [vmem:[#allocation2] sm:$0xff]   ;;  %vm113_vm1 = vcmask 261120   ;;  %v518_v6 = vld [vmem:[#allocation7 + $0x10] sm:$0xff]   ;;  %s658_s29 = smov [#allocation10]   ;;  %vm388_vm2 = vcmask 80896  }
  0x4b   :  { %462 = vmatprep.subr.bf16.mxu1 %v656_v0  ;;  %478 = vmatprep.mubr.msk.bf16.mxu1 %vm657_vm0, %v656_v0  ;;  %v517_v5 = vld [vmem:[#allocation7 + $0x8] sm:$0xff]   ;;  %v519_v7 = vld [vmem:[#allocation7 + $0x18] sm:$0xff]   ;;  %v520_v8 = vld [vmem:[#allocation7 + $0x20] sm:$0xff]   ;;  %s396_s30 = sshll.u32 %s658_s29, 4  ;;  %s397_s30 = int_to_ptr.vmem [resolvable:$true] %s396_s30 }
  0x4c   :  { %455 = vmatpush3.bf16.msra.mxu0 %v513_v1  ;;  %463 = vmatpush3.bf16.msra.mxu1 %v516_v3  ;;  %v521_v9 = vld [vmem:[#allocation7 + $0x28] sm:$0xff]   ;;  %v522_v10 = vld [vmem:[#allocation7 + $0x30] sm:$0xff]   ;;  %v523_v11 = vld [vmem:[#allocation7 + $0x38] sm:$0xff]   ;;  %p625_p5 = scmp.lt.s32.totalorder %s397_s30, %s397_s30 }
  0x4d   :  { %456 = vmatprep.subr.bf16.mxu0 %v656_v0  ;;  %464 = vmatprep.subr.bf16.mxu1 %v656_v0  ;;  %v524_v12 = vld [vmem:[#allocation8] sm:$0xff]   ;;  %v525_v13 = vld [vmem:[#allocation8 + $0x8] sm:$0xff]   ;;  %v526_v14 = vld [vmem:[#allocation8 + $0x10] sm:$0xff]  }
  0x4e   :  { %v527_v15 = vld [vmem:[#allocation8 + $0x18] sm:$0xff]   ;;  %v528_v16 = vld [vmem:[#allocation8 + $0x20] sm:$0xff]   ;;  %v529_v17 = vld [vmem:[#allocation8 + $0x28] sm:$0xff]  }
  0x4f   :  { %v410_v18 = vld [vmem:[%s822_s2] ss:$0 sm:$0xff]  ;;  %v530_v28 = vld [vmem:[#allocation8 + $0x30] sm:$0xff]   ;;  %v531_v29 = vld [vmem:[#allocation8 + $0x38] sm:$0xff]  }
  0x50   :  { %457 = vmatpush3.bf16.msra.mxu0 %v514_v2  ;;  %465 = vmatpush3.bf16.msra.mxu1 %v517_v5  ;;  %v415_v30 = vld [vmem:[%s824_s4] ss:$0 sm:$0xff]  ;;  %s620_s4 = scalar_lea.vmem %s397_s30, 256 }
  0x51   :  { %482 = vmatprep.subr.bf16.mxu0 %v656_v0  ;;  %466 = vmatprep.subr.bf16.mxu1 %v656_v0  ;;  %v424_v40 = vld [vmem:[%s826_s6] ss:$0 sm:$0xff]  ;;  %p621_p4 = scmp.ne.s32.totalorder %s397_s30, %s620_s4  ;;  %p626_p6 = scmp.lt.s32.totalorder %s620_s4, %s620_s4 }
  0x53   :  { %459 = vmatmul.mubr.msk.bf16.vlgmr.msra.gmra.mrb[0].mxu0 %vm113_vm1, %v515_v4  ;;  %p627_p7 = por %p626_p6, %p625_p5 }
  0x54   :  { %498 = vmatprep.mubr.msk.bf16.mxu0 %vm657_vm0, %v656_v0  ;;  %467 = vmatpush3.bf16.msra.mxu1 %v518_v6 }
  0x55   :  { %468 = vmatprep.subr.bf16.mxu1 %v656_v0  ;;  %483 = vmatpush3.bf16.msra.mxu0 %v524_v12  ;;  %p628_p8 = pnand %p627_p7, %p621_p4 }
  0x56   :  { %484 = vmatprep.subr.bf16.mxu0 %v656_v0 }
  0x58   :  { %469 = vmatpush3.bf16.msra.mxu1 %v519_v7 }
  0x59   :  { %470 = vmatprep.subr.bf16.mxu1 %v656_v0  ;;  %485 = vmatpush3.bf16.msra.mxu0 %v525_v13 }
  0x5a   :  { %486 = vmatprep.subr.bf16.mxu0 %v656_v0 }
  0x5c   :  { %471 = vmatpush3.bf16.msra.mxu1 %v520_v8 }
  0x5d   :  { %472 = vmatprep.subr.bf16.mxu1 %v656_v0  ;;  %487 = vmatpush3.bf16.msra.mxu0 %v526_v14 }
  0x5e   :  { %488 = vmatprep.subr.bf16.mxu0 %v656_v0 }
  0x60   :  { %473 = vmatpush3.bf16.msra.mxu1 %v521_v9 }
  0x61   :  { %474 = vmatprep.subr.bf16.mxu1 %v656_v0  ;;  %489 = vmatpush3.bf16.msra.mxu0 %v527_v15 }
  0x62   :  { %490 = vmatprep.subr.bf16.mxu0 %v656_v0 }
  0x64   :  { %475 = vmatpush3.bf16.msra.mxu1 %v522_v10 }
  0x65   :  { %476 = vmatprep.subr.bf16.mxu1 %v656_v0  ;;  %491 = vmatpush3.bf16.msra.mxu0 %v528_v16 }
  0x66   :  { %492 = vmatprep.subr.bf16.mxu0 %v656_v0 }
  0x68   :  { %477 = vmatpush3.bf16.msra.mxu1 %v523_v11 }
  0x69   :  { %493 = vmatpush3.bf16.msra.mxu0 %v529_v17 }
  0x6a   :  { %494 = vmatprep.subr.bf16.mxu0 %v656_v0 }
  0x6d   :  { %495 = vmatpush3.bf16.msra.mxu0 %v530_v28 }
  0x6e   :  { %496 = vmatprep.subr.bf16.mxu0 %v656_v0 }
  0x71   :  { %497 = vmatpush3.bf16.msra.mxu0 %v531_v29 }
 0x126   :  { %v151_v19 = vpop.f32.mrb[0].mxu0 }
 0x127   :  { %v152_v20 = vadd.f32 %v410_v18, %v151_v19  ;;  %v460_v21 = vpop.f32.mrb[1].mxu0 }
 0x128   :  { %v154_v22 = vpop.f32.mrb[2].mxu0 }
 0x129   :  { %v155_v23 = vadd.f32 %v410_v18, %v154_v22  ;;  %v461_v24 = vpop.f32.mrb[3].mxu0  ;;  %v158_v25 = vmax.f32 %v152_v20, 0.0 }
 0x12b   :  { %v159_v26 = vmax.f32 %v155_v23, 0.0 }
 0x12d   :  { %v160_v27 = vpack.c.bf16 %v159_v26, %v158_v25 }
 0x12f   :  { %479 = vmatmul.mubr.bf16.vlgmr.msra.gmra.mrb[0].mxu1 %v160_v27 }
 0x202   :  { %v266_v31 = vpop.f32.mrb[0].mxu1 }
 0x203   :  { %v267_v32 = vadd.f32 %v415_v30, %v266_v31  ;;  %v480_v33 = vpop.f32.mrb[1].mxu1 }
 0x204   :  { %v269_v34 = vpop.f32.mrb[2].mxu1 }
 0x205   :  { %v270_v35 = vadd.f32 %v415_v30, %v269_v34  ;;  %v481_v36 = vpop.f32.mrb[3].mxu1  ;;  %v273_v37 = vmax.f32 %v267_v32, 0.0 }
 0x207   :  { %v274_v38 = vmax.f32 %v270_v35, 0.0 }
 0x209   :  { %v275_v39 = vpack.c.bf16 %v274_v38, %v273_v37 }
 0x20b   :  { %499 = vmatmul.mubr.bf16.vlgmr.msra.gmra.mrb[4].mxu0 %v275_v39 }
 0x2de   :  { %v381_v41 = vpop.f32.mrb[4].mxu0 }
 0x2df   :  { %v382_v42 = vadd.f32 %v424_v40, %v381_v41  ;;  %v500_v43 = vpop.f32.mrb[5].mxu0 }
 0x2e0   :  { %v384_v44 = vpop.f32.mrb[6].mxu0 }
 0x2e1   :  { %389 = vst.msk [vmem:[#allocation10] sm:$0xff] %vm388_vm2, %v382_v42  ;;  %v385_v45 = vadd.f32 %v424_v40, %v384_v44  ;;  %v501_v46 = vpop.f32.mrb[7].mxu0 }
 0x2e3   :  { %390 = vst.msk [vmem:[#allocation10 + $0x8] sm:$0xff] %vm388_vm2, %v385_v45 }
 0x2e4   :  { %631 = shalt.err (!%p628_p8)
}
 0x2e5   :  { %s632_s9 = scalar_lea.hbm %s827_s7, 256 }
 0x2e6   :  { %p633_p9 = scmp.ne.s32.totalorder %s827_s7, %s632_s9  ;;  %p636_p10 = scmp.lt.u32.totalorder %s632_s9, %s827_s7 }
 0x2e8   :  { %p638_p11 = pnand %p636_p10, %p633_p9 }
 0x2ea   :  { %641 = shalt.err (!%p638_p11)
}
 0x2eb   :  { %s659_s16 = smov 128   ;;  %s660_s0 = smov 8  }
 0x2ec   :  { %402 = dma.vmem_to_hbm [thread:$0]  %s397_s30, 256, %s827_s7, [#allocation4], %s659_s16, %s659_s16, %s660_s0  }
 0x2ed   :  { %648 = dma.done.wait [#allocation4], 256  }
 0x2ee   :  { %649 = vsyncadd [#allocation4], 4294967040 }
 0x2ef   :  { %406 = vsyncpa [#allocation3], 1 }
 0x2f0   :  { %407 = vsyncpa [#allocation6], 1 }
 0x2f1   :  { %408 = vsyncpa [#allocation9], 1 }
 0x2f2   :  { %409 = vsyncpa [#allocation4], 1 }

</bundles_post_ra>
